<compile_context>
chip_gen: v7x
topology: tpu7x:2x2x1
jax: 0.10.0
libtpu: 0.0.40
codegen_flags: <defaults>
</compile_context>

<pallas_src>
import jax
import jax.numpy as jnp
from jax.experimental import pallas as pl
from jax.experimental.pallas import tpu as pltpu

_LANE = 128


def _round_up(x, m):
    return (x + m - 1) // m * m


def _halve_128(t):
    if t <= 128:
        return 128
    return max(128, ((t // 128) // 2) * 128)


def _tpu_vmem_capacity():
    try:
        info = pltpu.get_tpu_info()
        cap = getattr(info, "vmem_capacity_bytes", None)
        if cap:
            return int(cap)
    except Exception:
        pass
    return 64 * 1024 * 1024  # conservative: v7x per-TensorCore VMEM


def _vmem_need(tm, tk, fp, a_bytes, rhs_bytes, epi_bytes, out_bytes, use_scratch):
    # double-buffered inputs + output block (+ optional f32 accumulator scratch)
    need = 2 * (tm * tk * a_bytes
                + tk * fp * rhs_bytes
                + tm * fp * epi_bytes
                + tm * 4
                + tm * fp * out_bytes)
    if use_scratch:
        need += tm * fp * 4
    return need


def _choose_tiles(N, fp, a_bytes, rhs_bytes, epi_bytes, out_bytes, use_scratch,
                  tm_target, tk_target, budget):
    np128 = _round_up(N, 128)
    tm = min(_round_up(int(tm_target), 128), np128)
    tk = min(_round_up(int(tk_target), 128), np128)
    # Large feature widths: start smaller so the (tk,Fp)/(tm,Fp) slabs fit VMEM.
    if fp >= 2048:
        tm = min(tm, 256)
        tk = min(tk, 512)
    # v7x has 2 TensorCores sharing the 'parallel' row axis: keep >= 2 row
    # tiles on small graphs so one core is not idle (no-op on v5e/v6e).
    if np128 // tm < 2 and np128 >= 256:
        tm = min(tm, 128 * max(1, (np128 // 128) // 2))
    # Shrink to the VMEM budget.
    while _vmem_need(tm, tk, fp, a_bytes, rhs_bytes, epi_bytes, out_bytes,
                     use_scratch) > budget:
        if tk >= tm and tk > 128:
            tk = _halve_128(tk)
        elif tm > 128:
            tm = _halve_128(tm)
        else:
            break
    return tm, tk


def _compiler_params(need, budget):
    vmem_limit = int(min(max(need + (4 << 20), 16 << 20), budget))
    vmem_limit = max(vmem_limit, int(need))  # never below what we actually use
    return pltpu.CompilerParams(
        dimension_semantics=("parallel", "arbitrary"),
        vmem_limit_bytes=vmem_limit)


# ---------------------------------------------------------------------------
# Kernels
# ---------------------------------------------------------------------------
def _vsgc_agg_kernel(a_ref, rhs_ref, epi_ref, s_out_ref, out_ref, *scratch):
    """'lt' / 'yyy' propagation.  Grid = (row tiles, K tiles).

    a_ref    : (TM, TK)  adjacency tile (bf16, binary -> lossless)
    rhs_ref  : (TK, F)   pre-scaled RHS K-slab (bf16)
    epi_ref  : (TM, F)   pre-combined epilogue  c_pre*h + c_ini*(s_ini*ini_h)
    s_out_ref: (TM, 1)   c_agg * per-node output scale
    out_ref  : (TM, F)   output block (also the accumulator when f32)
    scratch  : optional (TM, F) f32 accumulator (only for non-f32 outputs)
    """
    acc_ref = scratch[0] if scratch else out_ref
    k = pl.program_id(1)

    @pl.when(k == 0)
    def _init():
        acc_ref[...] = jnp.zeros_like(acc_ref)

    # Native bf16 x bf16 -> f32 MXU matmul (no in-kernel upcast).
    acc_ref[...] += jnp.dot(a_ref[...], rhs_ref[...],
                            preferred_element_type=jnp.float32)

    @pl.when(k == pl.num_programs(1) - 1)
    def _finalize():
        out = acc_ref[...] * s_out_ref[...] + epi_ref[...]
        out_ref[...] = out.astype(out_ref.dtype)


def _exact_kernel(a_ref, h_ref, out_ref, *scratch):
    """'exact' propagation: plain tiled matmul (A stays f32 - not binary)."""
    acc_ref = scratch[0] if scratch else out_ref
    k = pl.program_id(1)

    @pl.when(k == 0)
    def _init():
        acc_ref[...] = jnp.zeros_like(acc_ref)

    acc_ref[...] += jnp.dot(a_ref[...], h_ref[...],
                            preferred_element_type=jnp.float32)

    if scratch:  # non-f32 output: copy/cast out of the f32 accumulator
        @pl.when(k == pl.num_programs(1) - 1)
        def _finalize():
            out_ref[...] = acc_ref[...].astype(out_ref.dtype)


# ---------------------------------------------------------------------------
# Wrappers
# ---------------------------------------------------------------------------
def _vsgc_propagate(a, h, ini_h, s_in, s_out, s_ini, *,
                    c_agg, c_pre, c_ini, tm=512, tk=1024,
                    a_dtype=jnp.bfloat16):
    # TODO(synk): on v7x, a_dtype=float8_e4m3 (exact for 0/1 A) halves the
    # dominant HBM stream; do NOT use fp8 on v5e/v6e.
    N, F = h.shape
    assert a.shape == (N, N)
    out_dtype = h.dtype

    # ---- hoisted per-node work (single fused XLA ops, not per grid step) ----
    rhs = (h * s_in).astype(jnp.bfloat16)          # bf16 rhs for native MXU bf16
    a = a.astype(a_dtype)                          # binary A -> lossless narrow cast
    ini_scaled = ini_h if s_ini is None else ini_h * s_ini
    epi = (c_pre * h + c_ini * ini_scaled).astype(jnp.float32)  # pre-combined epilogue
    s_out_scaled = (s_out * c_agg).astype(jnp.float32)          # fold c_agg into s_out

    Fp = _round_up(F, _LANE)
    a_bytes = jnp.dtype(a.dtype).itemsize
    rhs_bytes = 2
    epi_bytes = 4
    out_bytes = jnp.dtype(out_dtype).itemsize
    use_scratch = out_dtype != jnp.float32
    budget = int(0.55 * _tpu_vmem_capacity())

    tm, tk = _choose_tiles(N, Fp, a_bytes, rhs_bytes, epi_bytes, out_bytes,
                           use_scratch, tm, tk, budget)

    # Zero-pad to the tile grid (zeros are exact for this aggregation).
    Nr, Nk = _round_up(N, tm), _round_up(N, tk)
    a = jnp.pad(a, ((0, Nr - N), (0, Nk - N)))
    rhs = jnp.pad(rhs, ((0, Nk - N), (0, Fp - F)))
    epi = jnp.pad(epi, ((0, Nr - N), (0, Fp - F)))
    s_out_scaled = jnp.pad(s_out_scaled, ((0, Nr - N), (0, 0)))

    need = _vmem_need(tm, tk, Fp, a_bytes, rhs_bytes, epi_bytes, out_bytes,
                      use_scratch)
    n_row, n_k = Nr // tm, Nk // tk

    out = pl.pallas_call(
        _vsgc_agg_kernel,
        out_shape=jax.ShapeDtypeStruct((Nr, Fp), out_dtype),
        grid_spec=pltpu.PrefetchScalarGridSpec(
            num_scalar_prefetch=0,
            grid=(n_row, n_k),
            in_specs=[
                pl.BlockSpec((tm, tk), lambda i, k: (i, k)),   # A tile (bf16)
                pl.BlockSpec((tk, Fp), lambda i, k: (k, 0)),   # rhs K-slab (bf16)
                pl.BlockSpec((tm, Fp), lambda i, k: (i, 0)),   # epilogue row tile
                pl.BlockSpec((tm, 1), lambda i, k: (i, 0)),    # c_agg*s_out row tile
            ],
            out_specs=pl.BlockSpec((tm, Fp), lambda i, k: (i, 0)),
            scratch_shapes=([pltpu.VMEM((tm, Fp), jnp.float32)]
                            if use_scratch else []),
        ),
        compiler_params=_compiler_params(need, budget),
        cost_estimate=pl.CostEstimate(
            flops=2 * Nr * Nk * Fp,
            transcendentals=0,
            bytes_accessed=(Nr * Nk * a_bytes               # A stream
                            + n_row * Nk * Fp * rhs_bytes   # rhs re-streamed N/tm times
                            + Nr * Fp * (epi_bytes + out_bytes)
                            + Nr * 4)),
    )(a, rhs, epi, s_out_scaled)

    if (Nr, Fp) != (N, F):
        out = out[:N, :F]
    return out


def _exact_matmul(a, h, *, tm=512, tk=1024):
    N, F = h.shape
    assert a.shape == (N, N)
    out_dtype = h.dtype

    Fp = _round_up(F, _LANE)
    a_bytes = jnp.dtype(a.dtype).itemsize       # 'exact' is not binary: keep f32
    h_bytes = jnp.dtype(h.dtype).itemsize
    out_bytes = jnp.dtype(out_dtype).itemsize
    use_scratch = out_dtype != jnp.float32
    budget = int(0.55 * _tpu_vmem_capacity())

    tm, tk = _choose_tiles(N, Fp, a_bytes, h_bytes, 0, out_bytes,
                           use_scratch, tm, tk, budget)

    Nr, Nk = _round_up(N, tm), _round_up(N, tk)
    a = jnp.pad(a, ((0, Nr - N), (0, Nk - N)))
    hp = jnp.pad(h, ((0, Nk - N), (0, Fp - F)))

    need = _vmem_need(tm, tk, Fp, a_bytes, h_bytes, 0, out_bytes, use_scratch)
    n_row, n_k = Nr // tm, Nk // tk

    out = pl.pallas_call(
        _exact_kernel,
        out_shape=jax.ShapeDtypeStruct((Nr, Fp), out_dtype),
        grid_spec=pltpu.PrefetchScalarGridSpec(
            num_scalar_prefetch=0,
            grid=(n_row, n_k),
            in_specs=[
                pl.BlockSpec((tm, tk), lambda i, k: (i, k)),
                pl.BlockSpec((tk, Fp), lambda i, k: (k, 0)),
            ],
            out_specs=pl.BlockSpec((tm, Fp), lambda i, k: (i, 0)),
            scratch_shapes=([pltpu.VMEM((tm, Fp), jnp.float32)]
                            if use_scratch else []),
        ),
        compiler_params=_compiler_params(need, budget),
        cost_estimate=pl.CostEstimate(
            flops=2 * Nr * Nk * Fp,
            transcendentals=0,
            bytes_accessed=(Nr * Nk * a_bytes
                            + n_row * Nk * Fp * h_bytes
                            + Nr * Fp * out_bytes)),
    )(a, hp)

    if (Nr, Fp) != (N, F):
        out = out[:N, :F]
    return out


class VSGCLayerPallas:
    """JAX/Pallas port of VSGCLayer.forward.

    `graph` is a dict holding dense node data:
      'adj'   : (N, N) aggregation matrix (A[v,u] = 1 iff edge u->v)
      'nor_A', 'nor_X', 'D_in', 'D_out' : (N, 1) per-node scales
      'exact' : (N, N) dense exact-solution matrix
    tm/tk are row/contract tile targets (512/1024 default, all generations);
    they are rounded to multiples of 128, shrunk to the VMEM budget and to
    keep >= 2 row tiles, and N is zero-padded to the tile grid.
    """

    def __init__(self, alp=1, lam=1, propagation=0, tm=512, tk=1024):
        self.alp = alp
        self.lam = lam
        self.propagation = propagation
        self.tm = tm
        self.tk = tk

    def __call__(self, graph, h, ini_h):
        alp, lam = self.alp, self.lam
        if self.propagation == 'lt':
            return _vsgc_propagate(
                graph['adj'], h, ini_h,
                graph['nor_A'], graph['nor_A'], graph['nor_X'],
                c_agg=alp * lam, c_pre=1.0 - alp, c_ini=alp,
                tm=self.tm, tk=self.tk)
        elif self.propagation == 'yyy':
            return _vsgc_propagate(
                graph['adj'], h, ini_h,
                graph['D_out'], graph['D_in'], None,
                c_agg=alp * lam, c_pre=1.0 - alp * lam - alp, c_ini=alp,
                tm=self.tm, tk=self.tk)
        elif self.propagation == 'exact':
            return _exact_matmul(graph['exact'], h, tm=self.tm, tk=self.tk)
        return h  # propagation == 0 (default): identity, matches PyTorch


# ---------------------------------------------------------------------------
# Pure-JAX references (mirror the PyTorch/DGL semantics exactly)
# ---------------------------------------------------------------------------
def _mm(a, b):
    return jnp.dot(a, b, precision=jax.lax.Precision.HIGHEST)


def _ref_lt(graph, h, ini_h, alp, lam):
    nor_A, nor_X = graph['nor_A'], graph['nor_X']
    ini_h = ini_h * nor_X
    pre_h = h
    hh = _mm(graph['adj'], h * nor_A) * nor_A
    return alp * lam * hh + (1 - alp) * pre_h + alp * ini_h


def _ref_yyy(graph, h, ini_h, alp, lam):
    D_in, D_out = graph['D_in'], graph['D_out']
    pre_h = h
    hh = _mm(graph['adj'], h * D_out) * D_in
    return alp * lam * hh + (1 - alp * lam - alp) * pre_h + alp * ini_h


def _ref_exact(graph, h):
    return _mm(graph['exact'], h)


if __name__ == "__main__":
    key = jax.random.PRNGKey(0)
    # Deliberately NOT multiples of the tile sizes -> exercises the zero-padding path.
    N, F = 300, 96
    k_adj, k_h, k_ini, k_na, k_nx, k_di, k_do, k_ex = jax.random.split(key, 8)

    adj = (jax.random.uniform(k_adj, (N, N)) < 0.1).astype(jnp.float32)
    adj = adj + jnp.eye(N, dtype=jnp.float32)          # add self loops (binary A)
    h = jax.random.normal(k_h, (N, F), jnp.float32)
    ini_h = jax.random.normal(k_ini, (N, F), jnp.float32)
    nor_A = jax.random.uniform(k_na, (N, 1), jnp.float32, 0.1, 1.0)
    nor_X = jax.random.uniform(k_nx, (N, 1), jnp.float32, 0.1, 1.0)
    D_in = jax.random.uniform(k_di, (N, 1), jnp.float32, 0.1, 1.0)
    D_out = jax.random.uniform(k_do, (N, 1), jnp.float32, 0.1, 1.0)
    exact = jax.random.normal(k_ex, (N, N), jnp.float32) * 0.05

    graph = {'adj': adj, 'nor_A': nor_A, 'nor_X': nor_X,
             'D_in': D_in, 'D_out': D_out, 'exact': exact}

    alp, lam = 0.5, 1.0
    # bf16 rhs -> one bf16 rounding per element before an exact f32 accumulation.
    TOL = dict(atol=3e-2, rtol=3e-2)

    # 'lt' — small tiles so the (row, K) grid really loops (3x3 with padding).
    out_lt = VSGCLayerPallas(alp, lam, 'lt', tm=128, tk=128)(graph, h, ini_h)
    jax.block_until_ready(out_lt)
    ref_lt = _ref_lt(graph, h, ini_h, alp, lam)
    assert out_lt.shape == ref_lt.shape
    assert jnp.allclose(out_lt, ref_lt, **TOL)

    # 'lt' — default (large-tile, auto-shrunk) configuration.
    out_lt2 = VSGCLayerPallas(alp, lam, 'lt')(graph, h, ini_h)
    jax.block_until_ready(out_lt2)
    assert jnp.allclose(out_lt2, ref_lt, **TOL)

    # 'yyy'
    out_yyy = VSGCLayerPallas(alp, lam, 'yyy', tm=128, tk=128)(graph, h, ini_h)
    jax.block_until_ready(out_yyy)
    ref_yyy = _ref_yyy(graph, h, ini_h, alp, lam)
    assert jnp.allclose(out_yyy, ref_yyy, **TOL)

    # 'exact' — f32 matmul path (no narrow casts), tight tolerance.
    out_ex = VSGCLayerPallas(alp, lam, 'exact', tm=128, tk=128)(graph, h, ini_h)
    jax.block_until_ready(out_ex)
    ref_ex = _ref_exact(graph, h)
    assert jnp.allclose(out_ex, ref_ex, atol=1e-3, rtol=1e-3)

    # default propagation=0: identity pass-through (matches PyTorch forward)
    out_id = VSGCLayerPallas(alp, lam, 0)(graph, h, ini_h)
    jax.block_until_ready(out_id)
    assert jnp.allclose(out_id, h)

    print("KERNEL_OK")
</pallas_src>

<mosaic_0001>
module attributes {stable_mosaic.version = 11 : i64} {
  func.func @_vsgc_agg_kernel(%arg0: i32, %arg1: i32, %arg2: memref<128x128xbf16, #tpu.memory_space<vmem>>, %arg3: memref<128x128xbf16, #tpu.memory_space<vmem>>, %arg4: memref<128x128xf32, #tpu.memory_space<vmem>>, %arg5: memref<128x1xf32, #tpu.memory_space<vmem>>, %arg6: memref<128x128xf32, #tpu.memory_space<vmem>>) attributes {dimension_semantics = [#tpu.dimension_semantics<parallel>, #tpu.dimension_semantics<arbitrary>], iteration_bounds = array<i64: 3, 3>, scalar_prefetch = 0 : i64, scratch_operands = 0 : i64, tpu.core_type = #tpu.core_type<tc>, window_params = [{transform_indices = @transform_0, window_bounds = array<i64: 128, 128>}, {transform_indices = @transform_1, window_bounds = array<i64: 128, 128>}, {transform_indices = @transform_2, window_bounds = array<i64: 128, 128>}, {transform_indices = @transform_3, window_bounds = array<i64: 128, 1>}, {transform_indices = @transform_4, window_bounds = array<i64: 128, 128>}]} {
    %c0_i32 = arith.constant 0 : i32
    %0 = arith.cmpi eq, %arg1, %c0_i32 : i32
    %1 = arith.extui %0 : i1 to i32
    %c0_i32_0 = arith.constant 0 : i32
    %2 = arith.cmpi ne, %1, %c0_i32_0 : i32
    scf.if %2 {
      %cst_9 = arith.constant 0.000000e+00 : f32
      %12 = vector.broadcast %cst_9 : f32 to vector<128x128xf32>
      %c0_10 = arith.constant 0 : index
      %c0_11 = arith.constant 0 : index
      %13 = vector.load %arg6[%c0_10, %c0_11] : memref<128x128xf32, #tpu.memory_space<vmem>>, vector<128x128xf32>
      tpu.vector_store %arg6[%c0_10, %c0_11], %12 {strides = array<i32>} : memref<128x128xf32, #tpu.memory_space<vmem>>, vector<128x128xf32>,
    } else {
    }
    %c0 = arith.constant 0 : index
    %c0_1 = arith.constant 0 : index
    %3 = vector.load %arg6[%c0, %c0_1] : memref<128x128xf32, #tpu.memory_space<vmem>>, vector<128x128xf32>
    %c0_2 = arith.constant 0 : index
    %c0_3 = arith.constant 0 : index
    %4 = vector.load %arg2[%c0_2, %c0_3] : memref<128x128xbf16, #tpu.memory_space<vmem>>, vector<128x128xbf16>
    %c0_4 = arith.constant 0 : index
    %c0_5 = arith.constant 0 : index
    %5 = vector.load %arg3[%c0_4, %c0_5] : memref<128x128xbf16, #tpu.memory_space<vmem>>, vector<128x128xbf16>
    %cst = arith.constant dense<0.000000e+00> : vector<128x128xf32>
    %6 = tpu.matmul %4, %5, %cst {dimension_numbers = #tpu.dot_dimension_numbers<[1], [0], [0], [1], [0, 0, 1, 1], [], []>} : vector<128x128xbf16>, vector<128x128xbf16>, vector<128x128xf32> -> vector<128x128xf32>
    %7 = arith.addf %3, %6 : vector<128x128xf32>
    %c0_6 = arith.constant 0 : index
    %c0_7 = arith.constant 0 : index
    %8 = vector.load %arg6[%c0_6, %c0_7] : memref<128x128xf32, #tpu.memory_space<vmem>>, vector<128x128xf32>
    tpu.vector_store %arg6[%c0_6, %c0_7], %7 {strides = array<i32>} : memref<128x128xf32, #tpu.memory_space<vmem>>, vector<128x128xf32>,
    %c2_i32 = arith.constant 2 : i32
    %9 = arith.cmpi eq, %arg1, %c2_i32 : i32
    %10 = arith.extui %9 : i1 to i32
    %c0_i32_8 = arith.constant 0 : i32
    %11 = arith.cmpi ne, %10, %c0_i32_8 : i32
    scf.if %11 {
      %c0_9 = arith.constant 0 : index
      %c0_10 = arith.constant 0 : index
      %12 = vector.load %arg6[%c0_9, %c0_10] : memref<128x128xf32, #tpu.memory_space<vmem>>, vector<128x128xf32>
      %c0_11 = arith.constant 0 : index
      %c0_12 = arith.constant 0 : index
      %13 = vector.load %arg5[%c0_11, %c0_12] : memref<128x1xf32, #tpu.memory_space<vmem>>, vector<128x1xf32>
      %14 = vector.broadcast %13 : vector<128x1xf32> to vector<128x128xf32>
      %15 = arith.mulf %12, %14 : vector<128x128xf32>
      %c0_13 = arith.constant 0 : index
      %c0_14 = arith.constant 0 : index
      %16 = vector.load %arg4[%c0_13, %c0_14] : memref<128x128xf32, #tpu.memory_space<vmem>>, vector<128x128xf32>
      %17 = arith.addf %15, %16 : vector<128x128xf32>
      %c0_15 = arith.constant 0 : index
      %c0_16 = arith.constant 0 : index
      %18 = vector.load %arg6[%c0_15, %c0_16] : memref<128x128xf32, #tpu.memory_space<vmem>>, vector<128x128xf32>
      tpu.vector_store %arg6[%c0_15, %c0_16], %17 {strides = array<i32>} : memref<128x128xf32, #tpu.memory_space<vmem>>, vector<128x128xf32>,
    } else {
    }
    return
  }
  func.func @transform_0(%arg0: i32, %arg1: i32) -> (i32, i32) {
    %c0_i32 = arith.constant 0 : i32
    return %arg0, %arg1 : i32, i32
  }
  func.func @transform_1(%arg0: i32, %arg1: i32) -> (i32, i32) {
    %c0_i32 = arith.constant 0 : i32
    %c0_i32_0 = arith.constant 0 : i32
    return %arg1, %c0_i32 : i32, i32
  }
  func.func @transform_2(%arg0: i32, %arg1: i32) -> (i32, i32) {
    %c0_i32 = arith.constant 0 : i32
    %c0_i32_0 = arith.constant 0 : i32
    return %arg0, %c0_i32 : i32, i32
  }
  func.func @transform_3(%arg0: i32, %arg1: i32) -> (i32, i32) {
    %c0_i32 = arith.constant 0 : i32
    %c0_i32_0 = arith.constant 0 : i32
    return %arg0, %c0_i32 : i32, i32
  }
  func.func @transform_4(%arg0: i32, %arg1: i32) -> (i32, i32) {
    %c0_i32 = arith.constant 0 : i32
    %c0_i32_0 = arith.constant 0 : i32
    return %arg0, %c0_i32 : i32, i32
  }
}

</mosaic_0001>

<bundles_post_ra>
// kernel: tpu_custom_call.1
= control target key start
LH: loop header
LB: loop body
LE: loop exit
PB: predicated region body
PF: predicated region fallthrough
CT: control target
= control target key end

     0   :  { %s1945_s0 = inlined_call_operand.hbm [shape: bf16[384,384], index: 0, kind: input, shape index: {}]   ;;  %s1946_s1 = inlined_call_operand.hbm [shape: bf16[384,128], index: 1, kind: input, shape index: {}]   ;;  %s1947_s2 = inlined_call_operand.vmem [shape: f32[384,128], index: 2, kind: input, shape index: {}]   ;;  %s1948_s3 = inlined_call_operand.vmem [shape: f32[384,1], index: 3, kind: input, shape index: {}]   ;;  %s1949_s4 = inlined_call_operand.hbm [shape: f32[384,128], index: 4, kind: output, shape index: {}]  }
   0x1   :  { %1962 = sst [smem:[#allocation16_spill]] %s1945_s0 }
   0x2   :  { %1963 = sst [smem:[#allocation17_spill]] %s1947_s2 }
   0x3   :  { %1964 = sst [smem:[#allocation18_spill]] %s1948_s3 }
   0x4   :  { %1965 = sst [smem:[#allocation19_spill]] %s1949_s4 }
   0x5   :  { %9 = vsyncpa [#allocation3], 0 }
   0x6   :  { %11 = vsyncpa [#allocation3 + $0x1], 0 }
   0x7   :  { %12 = vsyncpa [#allocation6], 0 }
   0x8   :  { %14 = vsyncpa [#allocation6 + $0x1], 0 }
   0x9   :  { %15 = vsyncpa [#allocation4], 0 }
   0xa   :  { %17 = vsyncpa [#allocation4 + $0x1], 0  ;;  %s1452_s15 = smov 0   ;;  %s1454_s16 = smov 0  }
   0xb   :  { %s1456_s17 = smov 0   ;;  %s1458_s18 = smov 0  }
   0xc   :  { %s1460_s19 = smov 0   ;;  %s1462_s20 = smov 0  }
   0xd   :  { %s1464_s21 = smov 0   ;;  %s1466_s22 = smov 0  }
   0xe   :  { %s1468_s23 = smov 0   ;;  %s1470_s24 = smov 0  }
   0xf   :  { %s1472_s25 = smov 0   ;;  %s1474_s26 = smov 0  }
  0x10   :  { %s1476_s27 = smov 0   ;;  %s1478_s28 = smov 0  }
  0x11 LB: > { %1966 = sst [smem:[#allocation11_spill]] %s1399_s24  ;;  %s32_s29 = sadd.s32 1, %s1407_s26  ;;  %s1415_s28 = sphi %s1478_s28, %s23_s28   ;;  %s1411_s27 = sphi %s1476_s27, %s1999_s27   ;;  %s1407_s26 = sphi %s1474_s26, %s1998_s26   ;;  %s1403_s25 = sphi %s1472_s25, %s2010_s25   ;;  %s1399_s24 = sphi %s1470_s24, %s1996_s24   ;;  %s1395_s23 = sphi %s1468_s23, %s2009_s23   ;;  %s1391_s22 = sphi %s1466_s22, %s2008_s22   ;;  %s1387_s21 = sphi %s1464_s21, %s2007_s21   ;;  %s1383_s20 = sphi %s1462_s20, %s2006_s20   ;;  %s1379_s19 = sphi %s1460_s19, %s2005_s19   ;;  %s1375_s18 = sphi %s1458_s18, %s2004_s18   ;;  %s1371_s17 = sphi %s1456_s17, %s2003_s17   ;;  %s1367_s16 = sphi %s1454_s16, %s2002_s16   ;;  %s1363_s15 = sphi %s1452_s15, %s2001_s15  }
  0x12   : > { %1967 = sst [smem:[#allocation12_spill]] %s1407_s26  ;;  %s35_s30 = sadd.s32 1, %s1411_s27 }
  0x13   : > { %1968 = sst [smem:[#allocation13_spill]] %s1411_s27  ;;  %p33_p0 = scmp.ge.s32.totalorder %s32_s29, 3 }
  0x14   : > { %s44_s5 = sadd.s32 1, %s1395_s23  ;;  %p51_p1 = scmp.ne.s32.totalorder %s1395_s23, %s1391_s22 }
  0x15   : > { %p1954_p2 = scmp.eq.s32.totalorder %s1415_s28, 0  ;;  %s2012_s29 = smov (%p33_p0, %s32_s29), 0 }
  0x16   : > { %1969 = sst [smem:[#allocation14_spill]] %s2012_s29  ;;  %s2014_s30 = smov (!%p33_p0, %s35_s30), %s1411_s27 }
  0x17   : > { %s1533_s6 = ssub.s32 %s1407_s26, %s2012_s29  ;;  %p1537_p3 = por %p1954_p2, %p51_p1 }
  0x18   : > { %p37_p4 = scmp.ge.s32.totalorder %s2014_s30, 3  ;;  %s148_s8 = sadd.s32 1, %s1371_s17 }
  0x19   : > { %p1953_p7 = scmp.lt.s32.totalorder %s1415_s28, 9  ;;  %s185_s10 = sand.u32 1, %s1395_s23  }
  0x1a   : > { %s2016_s30 = smov (%p37_p4, %s2014_s30), 0  ;;  %s944_s14 = sshll.u32 %s185_s10, 6 }
  0x1b   : > { %1971 = sst [smem:[#allocation15_spill]] %s2016_s30  ;;  %s39_s9 = ssub.s32 %s1411_s27, %s2016_s30 }
  0x1c   : > { %s41_s11 = sor.u32 %s1533_s6, %s39_s9  ;;  %p146_p8 = scmp.eq.s32.totalorder %s39_s9, 0 }
  0x1d   : > { %p42_p9 = scmp.eq.s32.totalorder %s41_s11, 0  ;;  %s1048_s29 = smul.u32 48, %s1411_s27 }
  0x1e   : > { %s1553_s12 = scalar_select %p146_p8, %s1371_s17, %s148_s8  }
  0x1f   : > { %s1556_s13 = scalar_select %p42_p9, %s1395_s23, %s44_s5  }
  0x20   : > { %p1563_p10 = pnand %p1953_p7, %p1537_p3  ;;  %s195_s30 = sadd.s32 %s1407_s26, %s1048_s29 }
  0x21   : > { %s189_s24 = scalar_lea.vmem [#allocation2], %s944_s14  ;;  %s947_s2 = sshll.u32 %s195_s30, 6 }
  0x22   : > { %s198_s3 = sshll.u32 %s189_s24, 4  ;;  %s1973_s0 = sld [smem:[#allocation16_spill]]  ;;  %s1568_s3 = int_to_ptr.vmem [resolvable:$true] %s198_s3 }
  0x23   : > { %p951_p11 = scmp.ge.s32.totalorder %s1415_s28, 1  ;;  %s1576_s7 = scalar_lea.sflag [#allocation3], %s185_s10 }
  0x24   : > { %p1207_p13 = pneg %p1563_p10 }
  0x28   : > { %s1573_s5 = scalar_lea.hbm %s1973_s0, %s947_s2  ;;  %s1210_s2 = scalar_lea.hbm %s1973_s0, 9216 }
  0x29   : > { %s1205_s11 = scalar_lea.hbm %s1573_s5, 1024  ;;  %p1211_p3 = scmp.lt.u32.totalorder %s1573_s5, %s1973_s0 }
  0x2a   : > { %p1206_p12 = scmp.ne.s32.totalorder %s1573_s5, %s1205_s11  ;;  %p1212_p4 = scmp.lt.u32.totalorder %s1210_s2, %s1205_s11 }
  0x2b   : > { %p1214_p9 = scmp.lt.u32.totalorder %s1205_s11, %s1573_s5 }
  0x2c   : > { %p1208_p0 = pnand %p1207_p13, %p1206_p12  ;;  %p1213_p8 = por %p1212_p4, %p1211_p3 }
  0x2e   : > { %p1209_p1 = pneg %p1208_p0  ;;  %p1215_p7 = por %p1214_p9, %p1213_p8 }
  0x30   : > { %p1216_p2 = pnand %p1215_p7, %p1209_p1 }
  0x32   : > { %1219 = shalt.err (!%p1216_p2)
}
  0x33   : > { %s1220_s10 = scalar_lea.vmem %s1568_s3, 1024  ;;  %s1417_s8 = smov [#allocation2]  }
  0x34   : > { %p1221_p12 = scmp.ne.s32.totalorder %s1568_s3, %s1220_s10  ;;  %s1225_s9 = sshll.u32 %s1417_s8, 4  ;;  %s1226_s9 = int_to_ptr.vmem [resolvable:$false] %s1225_s9 }
  0x35   : > { %s1227_s24 = scalar_lea.vmem %s1226_s9, 2048  ;;  %p1228_p6 = scmp.lt.s32.totalorder %s1568_s3, %s1226_s9 }
  0x36   : > { %p1223_p0 = pnand %p1221_p12, %p1207_p13  ;;  %p1229_p3 = scmp.lt.s32.totalorder %s1227_s24, %s1220_s10 }
  0x38   : > { %p1224_p5 = pneg %p1223_p0  ;;  %p1230_p4 = por %p1229_p3, %p1228_p6 }
  0x3a   : > { %p1231_p8 = pnand %p1230_p4, %p1224_p5 }
  0x3c   : > { %1234 = shalt.err (!%p1231_p8)
}
  0x3d   : > { %s1418_s11 = smov 192   ;;  %s1955_s29 = smov 64  }
  0x3e   : > { %s1956_s2 = smov 4   ;;  %p245_p2 = scmp.lt.s32.totalorder %s1415_s28, 10 }
  0x3f   : > { %1058 = dma.hbm_to_vmem [thread:$0]  (!%p1563_p10), %s1573_s5, 1024, %s1568_s3, %s1576_s7, %s1418_s11, %s1955_s29, %s1956_s2  }
  0x40   : > { %p1609_p5 = pnand %p951_p11, %p245_p2  ;;  %s940_s14 = sadd.s32 4294967295, %s1415_s28  }
  0x41   : > { %s941_s10 = sadd.s32 4294967294, %s1415_s28   ;;  %p58_p6 = scmp.eq.s32.totalorder %s940_s14, 0 }
  0x42   : > { %s70_s8 = sadd.s32 1, %s1383_s20  ;;  %p1975_p7 = scmp.eq.s32.totalorder %s1533_s6, 0 }
  0x43   : > { %p1976_p13 = scmp.ne.s32.totalorder %s1391_s22, %s1387_s21  ;;  %p77_p10 = scmp.ne.s32.totalorder %s1383_s20, %s1379_s19 }
  0x44   : > { %s1619_s9 = scalar_select %p1975_p7, %s1383_s20, %s70_s8  }
  0x45   : > { %p1624_p1 = por %p58_p6, %p1976_p13  ;;  %p83_p11 = scmp.ne.s32.totalorder %s1379_s19, %s1375_s18 }
  0x46   : > { %p158_p9 = scmp.ne.s32.totalorder %s1371_s17, %s1367_s16  ;;  %p1978_p12 = scmp.eq.s32.totalorder %s1415_s28, 0 }
  0x47   : > { %s1977_s4 = scalar_select %p1624_p1, 1, 0 }
  0x48   : > { %p79_p0 = por %p77_p10, %p1978_p12  ;;  %p159_p3 = scmp.eq.s32.totalorder %s940_s14, 8 }
  0x49   : > { %p1636_p4 = por %p83_p11, %p58_p6  ;;  %p164_p8 = scmp.ne.s32.totalorder %s1367_s16, %s1363_s15 }
  0x4a   : > { %p1642_p2 = por %p159_p3, %p158_p9  ;;  %p165_p7 = scmp.eq.s32.totalorder %s941_s10, 8 }
  0x4b   : > { %s1979_s3 = scalar_select %p1636_p4, 1, 0 }
  0x4c   : > { %s1980_s6 = scalar_select %p1642_p2, 1, 0 }
  0x4d   : > { %s208_s21 = sand.u32 1, %s1383_s20   ;;  %s982_s5 = sshll.u32 %s1407_s26, 10 }
  0x4e   : > { %p1648_p13 = por %p165_p7, %p164_p8  ;;  %s948_s18 = sshll.u32 %s208_s21, 6 }
  0x4f   : > { %s1655_s14 = scalar_lea.hbm %s1946_s1, %s982_s5  ;;  %p1982_p6 = scmp.lt.s32.totalorder %s1415_s28, 9 }
  0x50   : > { %s1981_s7 = scalar_select %p1648_p13, 1, 0 }
  0x51   : > { %p1659_p10 = pnand %p1982_p6, %p79_p0  ;;  %s212_s10 = scalar_lea.vmem [#allocation5], %s948_s18 }
  0x52   : > { %s219_s29 = sshll.u32 %s212_s10, 4  ;;  %s1665_s2 = scalar_lea.sflag [#allocation6], %s208_s21  ;;  %s1663_s29 = int_to_ptr.vmem [resolvable:$true] %s219_s29 }
  0x53   : > { %s1235_s24 = scalar_lea.hbm %s1655_s14, 1024  ;;  %p1237_p9 = pneg %p1659_p10 }
  0x54   : > { %p1236_p11 = scmp.ne.s32.totalorder %s1655_s14, %s1235_s24  ;;  %s1240_s0 = scalar_lea.hbm %s1946_s1, 3072 }
  0x55   : > { %p1241_p0 = scmp.lt.u32.totalorder %s1655_s14, %s1946_s1  ;;  %p1242_p8 = scmp.lt.u32.totalorder %s1240_s0, %s1235_s24 }
  0x56   : > { %p1238_p12 = pnand %p1237_p9, %p1236_p11  ;;  %p1244_p6 = scmp.lt.u32.totalorder %s1235_s24, %s1655_s14 }
  0x57   : > { %p1243_p7 = por %p1242_p8, %p1241_p0 }
  0x58   : > { %p1239_p3 = pneg %p1238_p12 }
  0x59   : > { %p1245_p13 = por %p1244_p6, %p1243_p7 }
  0x5b   : > { %p1246_p2 = pnand %p1245_p13, %p1239_p3 }
  0x5d   : > { %1249 = shalt.err (!%p1246_p2)
}
  0x5e   : > { %s1250_s21 = scalar_lea.vmem %s1663_s29, 1024  ;;  %s1421_s18 = smov [#allocation5]  }
  0x5f   : > { %p1251_p11 = scmp.ne.s32.totalorder %s1663_s29, %s1250_s21  ;;  %s1255_s10 = sshll.u32 %s1421_s18, 4  ;;  %s1256_s10 = int_to_ptr.vmem [resolvable:$false] %s1255_s10 }
  0x60   : > { %s1257_s26 = scalar_lea.vmem %s1256_s10, 2048  ;;  %p1258_p1 = scmp.lt.s32.totalorder %s1663_s29, %s1256_s10 }
  0x61   : > { %p1253_p12 = pnand %p1251_p11, %p1237_p9  ;;  %p1259_p0 = scmp.lt.s32.totalorder %s1257_s26, %s1250_s21 }
  0x63   : > { %p1254_p4 = pneg %p1253_p12  ;;  %p1260_p8 = por %p1259_p0, %p1258_p1 }
  0x65   : > { %p1261_p7 = pnand %p1260_p8, %p1254_p4 }
  0x67   : > { %1264 = shalt.err (!%p1261_p7)
}
  0x68   : > { %s1984_s0 = smov 4   ;;  %s1985_s27 = smov 64  }
  0x69   : > { %1061 = dma.hbm_to_vmem [thread:$0]  (!%p1659_p10), %s1655_s14, 1024, %s1663_s29, %s1665_s2, %s1985_s27, %s1985_s27, %s1984_s0  }
  0x6a   : > { %249 = sbr.rel (%p1609_p5) target bundleno = 544 (0x220), region = 36  ;;  %s251_s24 = sand.u32 (!%p1609_p5), 1, %s1391_s22  }
  0x6b   : > { %s952_s5 = sshll.u32 (!%p1609_p5), %s251_s24, 6  ;;  %s252_s11 = scalar_lea.sflag (!%p1609_p5), [#allocation3], %s251_s24 }
  0x6c   : > { %s1699_s21 = scalar_lea.vmem (!%p1609_p5), [#allocation2], %s952_s5  ;;  %p1986_p1 = scmp.ne.s32.totalorder (!%p1609_p5), %s1977_s4, 0 }
  0x71   : > { %1350 = dma.done.wait (%p1986_p1), %s252_s11, 1024  }
  0x72   : > { %1352 = vsyncadd (%p1986_p1), %s252_s11, 4294966272  ;;  %s260_s8 = sand.u32 1, %s1379_s19   ;;  %p1987_p5 = scmp.ne.s32.totalorder %s1979_s3, 0 }
  0x73   : > { %s953_s18 = sshll.u32 %s260_s8, 6  ;;  %s261_s29 = scalar_lea.sflag [#allocation6], %s260_s8 }
  0x74   : > { %s1706_s2 = scalar_lea.vmem [#allocation5], %s953_s18 }
  0x75   : > { %1354 = dma.done.wait (%p1987_p5), %s261_s29, 1024  }
  0x76   : > { %1356 = vsyncadd (%p1987_p5), %s261_s29, 4294966272  ;;  %s301_s30 = sand.u32 1, %s1367_s16   ;;  %s955_s14 = sshll.u32 %s1403_s25, 4 }
  0x77   : > { %s954_s4 = sshll.u32 %s301_s30, 7  ;;  %p307_p4 = scmp.lt.s32.totalorder %s955_s14, 47 }
  0x78   : > { %s1988_s27 = sld [smem:[#allocation17_spill]]  ;;  %s1989_s8 = sld [smem:[#allocation18_spill]] }
  0x79   : > { %s2018_s14 = smov (!%p307_p4, %s955_s14), 47  ;;  %s1726_s18 = scalar_lea.vmem [#allocation7], %s954_s4 }
  0x7a   : > { %s956_s10 = sshll.u32 %s2018_s14, 3  ;;  %s1990_s29 = sld [smem:[#allocation11_spill]] }
  0x7e   : > { %s1719_s24 = scalar_lea.vmem %s1988_s27, %s956_s10  ;;  %s1724_s3 = scalar_lea.vmem %s1989_s8, %s956_s10 }
  0x80   : > { %p959_p2 = scmp.ne.s32.totalorder %s1990_s29, 0 }
  0x81   : > { %v1422_v0 = vmov (!%p959_p2), 0.0  }
  0x82   : > { %323 = sbr.rel (%p959_p2) target bundleno = 138 (0x8a), region = 48  ;;  %324 = vst [vmem:[%s1726_s18] sm:$0xff] (!%p959_p2), %v1422_v0  ;;  %325 = vst [vmem:[%s1726_s18 + $0x8] sm:$0xff] (!%p959_p2), %v1422_v0 }
  0x83   : > { %326 = vst [vmem:[%s1726_s18 + $0x10] sm:$0xff] (!%p959_p2), %v1422_v0  ;;  %327 = vst [vmem:[%s1726_s18 + $0x18] sm:$0xff] (!%p959_p2), %v1422_v0 }
  0x84   : > { %328 = vst [vmem:[%s1726_s18 + $0x20] sm:$0xff] (!%p959_p2), %v1422_v0  ;;  %329 = vst [vmem:[%s1726_s18 + $0x28] sm:$0xff] (!%p959_p2), %v1422_v0 }
  0x85   : > { %330 = vst [vmem:[%s1726_s18 + $0x30] sm:$0xff] (!%p959_p2), %v1422_v0  ;;  %331 = vst [vmem:[%s1726_s18 + $0x38] sm:$0xff] (!%p959_p2), %v1422_v0 }
  0x86   : > { %332 = vst [vmem:[%s1726_s18 + $0x40] sm:$0xff] (!%p959_p2), %v1422_v0  ;;  %333 = vst [vmem:[%s1726_s18 + $0x48] sm:$0xff] (!%p959_p2), %v1422_v0 }
  0x87   : > { %334 = vst [vmem:[%s1726_s18 + $0x50] sm:$0xff] (!%p959_p2), %v1422_v0  ;;  %335 = vst [vmem:[%s1726_s18 + $0x58] sm:$0xff] (!%p959_p2), %v1422_v0 }
  0x88   : > { %336 = vst [vmem:[%s1726_s18 + $0x60] sm:$0xff] (!%p959_p2), %v1422_v0  ;;  %337 = vst [vmem:[%s1726_s18 + $0x68] sm:$0xff] (!%p959_p2), %v1422_v0 }
  0x89   : > { %338 = vst [vmem:[%s1726_s18 + $0x70] sm:$0xff] %v1422_v0  ;;  %339 = vst [vmem:[%s1726_s18 + $0x78] sm:$0xff] %v1422_v0 }
  0x8a PF: > { %v1187_v1 = vld [vmem:[%s1706_s2] sm:$0xff]   ;;  %v1188_v2 = vld [vmem:[%s1706_s2 + $0x8] sm:$0xff]   ;;  %v1189_v3 = vld [vmem:[%s1706_s2 + $0x10] sm:$0xff]  }
  0x8b   : > { %1000 = vmatprep.subr.bf16.mxu0 %v1187_v1  ;;  %1032 = vmatprep.subr.bf16.mxu1 %v1187_v1  ;;  %v1190_v4 = vld [vmem:[%s1706_s2 + $0x18] sm:$0xff]   ;;  %v1195_v5 = vld [vmem:[%s1699_s21] sm:$0xff]   ;;  %v1192_v8 = vld [vmem:[%s1706_s2 + $0x28] sm:$0xff]  }
  0x8c   : > { %1001 = vmatpush3.bf16.msra.mxu0 %v1187_v1  ;;  %1040 = vmatpush3.bf16.msra.mxu1 %v1187_v1  ;;  %v1196_v6 = vld [vmem:[%s1699_s21 + $0x20] sm:$0xff]   ;;  %v1193_v9 = vld [vmem:[%s1706_s2 + $0x30] sm:$0xff]   ;;  %v1194_v10 = vld [vmem:[%s1706_s2 + $0x38] sm:$0xff]  }
  0x8d   : > { %1002 = vmatprep.subr.bf16.mxu0 %v1188_v2  ;;  %1033 = vmatprep.subr.bf16.mxu1 %v1188_v2  ;;  %v1191_v7 = vld [vmem:[%s1706_s2 + $0x20] sm:$0xff]   ;;  %v1197_v11 = vld [vmem:[%s1699_s21 + $0x8] sm:$0xff]   ;;  %v1199_v13 = vld [vmem:[%s1699_s21 + $0x10] sm:$0xff]  }
  0x8e   : > { %1016 = vmatprep.mubr.bf16.mxu0 %v1195_v5  ;;  %1024 = vmatprep.mubr.bf16.mxu1 %v1196_v6  ;;  %v1198_v12 = vld [vmem:[%s1699_s21 + $0x28] sm:$0xff]   ;;  %v1200_v14 = vld [vmem:[%s1699_s21 + $0x30] sm:$0xff]   ;;  %v1201_v15 = vld [vmem:[%s1699_s21 + $0x18] sm:$0xff]  }
  0x8f   : > { %v1202_v16 = vld [vmem:[%s1699_s21 + $0x38] sm:$0xff]   ;;  %v342_v17 = vld [vmem:[%s1726_s18 + $0x10] sm:$0xff]  ;;  %v340_v19 = vld [vmem:[%s1726_s18] sm:$0xff]  ;;  %s1991_s21 = sld [smem:[#allocation11_spill]] }
  0x90   : > { %1003 = vmatpush3.bf16.msra.mxu0 %v1188_v2  ;;  %1041 = vmatpush3.bf16.msra.mxu1 %v1188_v2  ;;  %v350_v18 = vld [vmem:[%s1726_s18 + $0x50] sm:$0xff]  ;;  %v348_v20 = vld [vmem:[%s1726_s18 + $0x40] sm:$0xff]  ;;  %v343_v23 = vld [vmem:[%s1726_s18 + $0x18] sm:$0xff] }
  0x91   : > { %1004 = vmatprep.subr.bf16.mxu0 %v1189_v3  ;;  %1034 = vmatprep.subr.bf16.mxu1 %v1189_v3  ;;  %v351_v24 = vld [vmem:[%s1726_s18 + $0x58] sm:$0xff]  ;;  %v341_v29 = vld [vmem:[%s1726_s18 + $0x8] sm:$0xff]  ;;  %v346_v41 = vld [vmem:[%s1726_s18 + $0x30] sm:$0xff] }
  0x92   : > { %v349_v30 = vld [vmem:[%s1726_s18 + $0x48] sm:$0xff]  ;;  %v354_v42 = vld [vmem:[%s1726_s18 + $0x70] sm:$0xff]  ;;  %v344_v43 = vld [vmem:[%s1726_s18 + $0x20] sm:$0xff] }
  0x93   : > { %v352_v44 = vld [vmem:[%s1726_s18 + $0x60] sm:$0xff]  ;;  %v347_v47 = vld [vmem:[%s1726_s18 + $0x38] sm:$0xff]  ;;  %v345_v53 = vld [vmem:[%s1726_s18 + $0x28] sm:$0xff] }
  0x94   : > { %1005 = vmatpush3.bf16.msra.mxu0 %v1189_v3  ;;  %1042 = vmatpush3.bf16.msra.mxu1 %v1189_v3  ;;  %v355_v48 = vld [vmem:[%s1726_s18 + $0x78] sm:$0xff]  ;;  %v353_v54 = vld [vmem:[%s1726_s18 + $0x68] sm:$0xff] }
  0x95   : > { %1006 = vmatprep.subr.bf16.mxu0 %v1190_v4  ;;  %1035 = vmatprep.subr.bf16.mxu1 %v1190_v4  ;;  %p976_p13 = scmp.ne.s32.totalorder %s1991_s21, 2 }
  0x96   : > { %v635_v1 = vld [vmem:[%s1724_s3 + $0x10] sm:$0xff] (!%p976_p13)  ;;  %v633_v2 = vld [vmem:[%s1724_s3] sm:$0xff] (!%p976_p13)  ;;  %v1423_v3 = vmov (!%p976_p13), 0   ;;  %v634_v5 = vld [vmem:[%s1724_s3 + $0x8] sm:$0xff] (!%p976_p13) }
  0x97   : > { %1204 = vset.pattern.permute.xlu1 (!%p976_p13), %v1423_v3  ;;  %1203 = vset.pattern.permute.xlu0 (!%p976_p13), %v1423_v3  ;;  %v638_v6 = vld [vmem:[%s1724_s3 + $0x28] sm:$0xff] (!%p976_p13) }
  0x98   : > { %1007 = vmatpush3.bf16.msra.mxu0 %v1190_v4  ;;  %1043 = vmatpush3.bf16.msra.mxu1 %v1190_v4  ;;  %v636_v4 = vld [vmem:[%s1724_s3 + $0x18] sm:$0xff] (!%p976_p13) }
  0x99   : > { %1008 = vmatprep.subr.bf16.mxu0 %v1191_v7  ;;  %1036 = vmatprep.subr.bf16.mxu1 %v1191_v7 }
  0x9a   : > { %661 = vperm.xlu1 (!%p976_p13), %1204, %v635_v1   ;;  %651 = vperm.xlu0 (!%p976_p13), %1203, %v633_v2  }
  0x9c   : > { %1009 = vmatpush3.bf16.msra.mxu0 %v1191_v7  ;;  %1044 = vmatpush3.bf16.msra.mxu1 %v1191_v7  ;;  %v637_v7 = vld [vmem:[%s1724_s3 + $0x20] sm:$0xff] (!%p976_p13) }
  0x9d   : > { %1010 = vmatprep.subr.bf16.mxu0 %v1192_v8  ;;  %1037 = vmatprep.subr.bf16.mxu1 %v1192_v8 }
  0x9e   : > { %666 = vperm.xlu1 (!%p976_p13), %1204, %v636_v4   ;;  %656 = vperm.xlu0 (!%p976_p13), %1203, %v634_v5  }
  0xa0   : > { %1011 = vmatpush3.bf16.msra.mxu0 %v1192_v8  ;;  %1045 = vmatpush3.bf16.msra.mxu1 %v1192_v8  ;;  %v640_v8 = vld [vmem:[%s1724_s3 + $0x38] sm:$0xff] (!%p976_p13) }
  0xa1   : > { %1012 = vmatprep.subr.bf16.mxu0 %v1193_v9  ;;  %1038 = vmatprep.subr.bf16.mxu1 %v1193_v9 }
  0xa2   : > { %676 = vperm.xlu1 (!%p976_p13), %1204, %v638_v6   ;;  %671 = vperm.xlu0 (!%p976_p13), %1203, %v637_v7   ;;  %v756_v6 = vld [vmem:[%s1719_s24 + $0x58] sm:$0xff] (!%p976_p13) }
  0xa4   : > { %1013 = vmatpush3.bf16.msra.mxu0 %v1193_v9  ;;  %1046 = vmatpush3.bf16.msra.mxu1 %v1193_v9  ;;  %v639_v9 = vld [vmem:[%s1724_s3 + $0x30] sm:$0xff] (!%p976_p13) }
  0xa5   : > { %1014 = vmatprep.subr.bf16.mxu0 %v1194_v10  ;;  %1039 = vmatprep.subr.bf16.mxu1 %v1194_v10 }
  0xa6   : > { %686 = vperm.xlu1 (!%p976_p13), %1204, %v640_v8   ;;  %681 = vperm.xlu0 (!%p976_p13), %1203, %v639_v9   ;;  %v755_v8 = vld [vmem:[%s1719_s24 + $0x50] sm:$0xff] (!%p976_p13) }
  0xa8   : > { %1015 = vmatpush3.bf16.msra.mxu0 %v1194_v10  ;;  %1047 = vmatpush3.bf16.msra.mxu1 %v1194_v10  ;;  %v642_v10 = vld [vmem:[%s1724_s3 + $0x48] sm:$0xff] (!%p976_p13) }
  0xaa   : > { %696 = vperm.xlu1 (!%p976_p13), %1204, %v642_v10  }
  0xab   : > { %1017 = vmatmul.mubr.bf16.vlgmr.msra.gmra.mrb[0].mxu0 %v1197_v11  ;;  %1025 = vmatmul.mubr.bf16.vlgmr.msra.gmra.mrb[0].mxu1 %v1198_v12  ;;  %v641_v11 = vld [vmem:[%s1724_s3 + $0x40] sm:$0xff] (!%p976_p13)  ;;  %v644_v12 = vld [vmem:[%s1724_s3 + $0x58] sm:$0xff] (!%p976_p13) }
  0xac   : > { %1020 = vmatprep.mubr.bf16.mxu0 %v1199_v13  ;;  %1028 = vmatprep.mubr.bf16.mxu1 %v1200_v14  ;;  %v643_v13 = vld [vmem:[%s1724_s3 + $0x50] sm:$0xff] (!%p976_p13)  ;;  %v646_v14 = vld [vmem:[%s1724_s3 + $0x68] sm:$0xff] (!%p976_p13) }
  0xad   : > { %691 = vperm.xlu0 (!%p976_p13), %1203, %v641_v11  }
  0xae   : > { %706 = vperm.xlu1 (!%p976_p13), %1204, %v644_v12  }
  0xb1   : > { %701 = vperm.xlu0 (!%p976_p13), %1203, %v643_v13  }
  0xb2   : > { %716 = vperm.xlu1 (!%p976_p13), %1204, %v646_v14  }
  0xb3   : > { %1021 = vmatmul.mubr.bf16.gmra.mrb[4].mxu0 %v1201_v15  ;;  %1029 = vmatmul.mubr.bf16.gmra.mrb[4].mxu1 %v1202_v16  ;;  %v645_v15 = vld [vmem:[%s1724_s3 + $0x60] sm:$0xff] (!%p976_p13)  ;;  %v648_v16 = vld [vmem:[%s1724_s3 + $0x78] sm:$0xff] (!%p976_p13) }
  0xb5   : > { %711 = vperm.xlu0 (!%p976_p13), %1203, %v645_v15  }
  0xb6   : > { %726 = vperm.xlu1 (!%p976_p13), %1204, %v648_v16   ;;  %v758_v16 = vld [vmem:[%s1719_s24 + $0x68] sm:$0xff] (!%p976_p13) }
 0x17e   : > { %v1018_v21 = vpop.f32.mrb[0].mxu0  ;;  %v1026_v22 = vpop.f32.mrb[0].mxu1 }
 0x17f   : > { %v583_v25 = vadd.f32 %v1018_v21, %v342_v17  ;;  %v591_v26 = vadd.f32 %v1026_v22, %v350_v18  ;;  %v518_v27 = vpop.f32.mrb[1].mxu0  ;;  %v550_v28 = vpop.f32.mrb[1].mxu1  ;;  %v647_v17 = vld [vmem:[%s1724_s3 + $0x70] sm:$0xff] (!%p976_p13)  ;;  %v745_v22 = vld [vmem:[%s1719_s24] sm:$0xff] (!%p976_p13) }
 0x180   : > { %v581_v31 = vadd.f32 %v518_v27, %v340_v19  ;;  %v589_v32 = vadd.f32 %v550_v28, %v348_v20  ;;  %v1019_v33 = vpop.f32.mrb[2].mxu0  ;;  %v1027_v34 = vpop.f32.mrb[2].mxu1  ;;  %721 = vperm.xlu0 (!%p976_p13), %1203, %v647_v17   ;;  %v747_v20 = vld [vmem:[%s1719_s24 + $0x10] sm:$0xff] (!%p976_p13) }
 0x181   : > { %599 = vst [vmem:[%s1726_s18 + $0x10] sm:$0xff] %v583_v25  ;;  %607 = vst [vmem:[%s1726_s18 + $0x50] sm:$0xff] %v591_v26  ;;  %v584_v35 = vadd.f32 %v1019_v33, %v343_v23  ;;  %v592_v36 = vadd.f32 %v1027_v34, %v351_v24  ;;  %v521_v37 = vpop.f32.mrb[3].mxu0  ;;  %v553_v38 = vpop.f32.mrb[3].mxu1 }
 0x182   : > { %597 = vst [vmem:[%s1726_s18] sm:$0xff] %v581_v31  ;;  %605 = vst [vmem:[%s1726_s18 + $0x40] sm:$0xff] %v589_v32  ;;  %v582_v39 = vadd.f32 %v521_v37, %v341_v29  ;;  %v590_v40 = vadd.f32 %v553_v38, %v349_v30  ;;  %v662_v21 = vpop.permute.xlu1 (!%p976_p13), %661  ;;  %v652_v23 = vpop.permute.xlu0 (!%p976_p13), %651  ;;  %v748_v30 = vld [vmem:[%s1719_s24 + $0x18] sm:$0xff] (!%p976_p13)  ;;  %v746_v32 = vld [vmem:[%s1719_s24 + $0x8] sm:$0xff] (!%p976_p13) }
 0x183   : > { %600 = vst [vmem:[%s1726_s18 + $0x18] sm:$0xff] %v584_v35  ;;  %608 = vst [vmem:[%s1726_s18 + $0x58] sm:$0xff] %v592_v36 }
 0x184   : > { %598 = vst [vmem:[%s1726_s18 + $0x8] sm:$0xff] %v582_v39  ;;  %606 = vst [vmem:[%s1726_s18 + $0x48] sm:$0xff] %v590_v40  ;;  %v750_v40 = vld [vmem:[%s1719_s24 + $0x28] sm:$0xff] (!%p976_p13) }
 0x186   : > { %v1022_v45 = vpop.f32.mrb[4].mxu0  ;;  %v1030_v46 = vpop.f32.mrb[4].mxu1  ;;  %616 = sbr.rel (%p976_p13) target bundleno = 517 (0x205), region = 52 }
 0x187   : > { %v587_v49 = vadd.f32 %v1022_v45, %v346_v41  ;;  %v595_v50 = vadd.f32 %v1030_v46, %v354_v42  ;;  %v534_v51 = vpop.f32.mrb[5].mxu0  ;;  %v566_v52 = vpop.f32.mrb[5].mxu1  ;;  %v749_v42 = vld [vmem:[%s1719_s24 + $0x20] sm:$0xff] (!%p976_p13) }
 0x188   : > { %v585_v55 = vadd.f32 %v534_v51, %v344_v43  ;;  %v593_v56 = vadd.f32 %v566_v52, %v352_v44  ;;  %v1023_v57 = vpop.f32.mrb[6].mxu0  ;;  %v1031_v58 = vpop.f32.mrb[6].mxu1  ;;  %v619_v18 = vld [vmem:[%s1726_s18 + $0x10] sm:$0xff] (!%p976_p13) }
 0x189   : > { %603 = vst [vmem:[%s1726_s18 + $0x30] sm:$0xff] %v587_v49  ;;  %611 = vst [vmem:[%s1726_s18 + $0x70] sm:$0xff] %v595_v50  ;;  %v588_v59 = vadd.f32 %v1023_v57, %v347_v47  ;;  %v596_v60 = vadd.f32 %v1031_v58, %v355_v48  ;;  %v537_v61 = vpop.f32.mrb[7].mxu0  ;;  %v569_v62 = vpop.f32.mrb[7].mxu1  ;;  %v617_v19 = vld [vmem:[%s1726_s18] sm:$0xff] (!%p976_p13)  ;;  %v731_v24 = vmul.f32 (!%p976_p13), %v662_v21, %v619_v18  ;;  %v752_v50 = vld [vmem:[%s1719_s24 + $0x38] sm:$0xff] (!%p976_p13) }
 0x18a   : > { %601 = vst [vmem:[%s1726_s18 + $0x20] sm:$0xff] %v585_v55  ;;  %609 = vst [vmem:[%s1726_s18 + $0x60] sm:$0xff] %v593_v56  ;;  %v586_v63 = vadd.f32 %v537_v61, %v345_v53  ;;  %v594_v0 = vadd.f32 %v569_v62, %v353_v54  ;;  %v729_v25 = vmul.f32 (!%p976_p13), %v652_v23, %v617_v19  ;;  %v620_v26 = vld [vmem:[%s1726_s18 + $0x18] sm:$0xff] (!%p976_p13)  ;;  %v667_v31 = vpop.permute.xlu1 (!%p976_p13), %666  ;;  %v657_v33 = vpop.permute.xlu0 (!%p976_p13), %656  ;;  %v751_v52 = vld [vmem:[%s1719_s24 + $0x30] sm:$0xff] (!%p976_p13) }
 0x18b   : > { %604 = vst [vmem:[%s1726_s18 + $0x38] sm:$0xff] %v588_v59  ;;  %612 = vst [vmem:[%s1726_s18 + $0x78] sm:$0xff] %v596_v60  ;;  %v618_v27 = vld [vmem:[%s1726_s18 + $0x8] sm:$0xff] (!%p976_p13)  ;;  %v763_v28 = vadd.f32 (!%p976_p13), %v747_v20, %v731_v24  ;;  %v732_v34 = vmul.f32 (!%p976_p13), %v667_v31, %v620_v26  ;;  %v625_v57 = vld [vmem:[%s1726_s18 + $0x40] sm:$0xff] (!%p976_p13) }
 0x18c   : > { %602 = vst [vmem:[%s1726_s18 + $0x28] sm:$0xff] %v586_v63  ;;  %610 = vst [vmem:[%s1726_s18 + $0x68] sm:$0xff] %v594_v0  ;;  %v761_v29 = vadd.f32 (!%p976_p13), %v745_v22, %v729_v25  ;;  %v730_v35 = vmul.f32 (!%p976_p13), %v657_v33, %v618_v27  ;;  %v626_v56 = vld [vmem:[%s1726_s18 + $0x48] sm:$0xff] (!%p976_p13)  ;;  %v753_v62 = vld [vmem:[%s1719_s24 + $0x40] sm:$0xff] (!%p976_p13) }
 0x18d   : > { %779 = vst [vmem:[%s1726_s18 + $0x10] sm:$0xff] %v763_v28  ;;  %v764_v38 = vadd.f32 %v748_v30, %v732_v34  ;;  %v754_v60 = vld [vmem:[%s1719_s24 + $0x48] sm:$0xff]  ;;  %v628_v2 = vld [vmem:[%s1726_s18 + $0x58] sm:$0xff]  ;;  %v627_v3 = vld [vmem:[%s1726_s18 + $0x50] sm:$0xff] }
 0x18e   : > { %777 = vst [vmem:[%s1726_s18] sm:$0xff] %v761_v29  ;;  %v762_v39 = vadd.f32 %v746_v32, %v730_v35  ;;  %v677_v41 = vpop.permute.xlu1 %676  ;;  %v672_v43 = vpop.permute.xlu0 %671  ;;  %v757_v18 = vld [vmem:[%s1719_s24 + $0x60] sm:$0xff]  ;;  %v760_v26 = vld [vmem:[%s1719_s24 + $0x78] sm:$0xff]  ;;  %v759_v28 = vld [vmem:[%s1719_s24 + $0x70] sm:$0xff] }
 0x18f   : > { %780 = vst [vmem:[%s1726_s18 + $0x18] sm:$0xff] %v764_v38 }
 0x190   : > { %778 = vst [vmem:[%s1726_s18 + $0x8] sm:$0xff] %v762_v39  ;;  %v623_v47 = vld [vmem:[%s1726_s18 + $0x30] sm:$0xff] }
 0x191   : > { %v621_v37 = vld [vmem:[%s1726_s18 + $0x20] sm:$0xff]  ;;  %v631_v23 = vld [vmem:[%s1726_s18 + $0x70] sm:$0xff] }
 0x192   : > { %v733_v45 = vmul.f32 %v672_v43, %v621_v37  ;;  %v624_v46 = vld [vmem:[%s1726_s18 + $0x38] sm:$0xff]  ;;  %v687_v51 = vpop.permute.xlu1 %686  ;;  %v682_v53 = vpop.permute.xlu0 %681  ;;  %v629_v13 = vld [vmem:[%s1726_s18 + $0x60] sm:$0xff] }
 0x193   : > { %v622_v36 = vld [vmem:[%s1726_s18 + $0x28] sm:$0xff]  ;;  %v736_v54 = vmul.f32 %v687_v51, %v624_v46  ;;  %v735_v55 = vmul.f32 %v682_v53, %v623_v47  ;;  %v632_v22 = vld [vmem:[%s1726_s18 + $0x78] sm:$0xff] }
 0x194   : > { %v734_v44 = vmul.f32 %v677_v41, %v622_v36  ;;  %v765_v49 = vadd.f32 %v749_v42, %v733_v45  ;;  %v630_v12 = vld [vmem:[%s1726_s18 + $0x68] sm:$0xff] }
 0x195   : > { %v768_v58 = vadd.f32 %v752_v50, %v736_v54  ;;  %v767_v59 = vadd.f32 %v751_v52, %v735_v55 }
 0x196   : > { %v766_v48 = vadd.f32 %v750_v40, %v734_v44  ;;  %781 = vst [vmem:[%s1726_s18 + $0x20] sm:$0xff] %v765_v49  ;;  %v697_v61 = vpop.permute.xlu1 %696  ;;  %v692_v63 = vpop.permute.xlu0 %691 }
 0x197   : > { %784 = vst [vmem:[%s1726_s18 + $0x38] sm:$0xff] %v768_v58  ;;  %783 = vst [vmem:[%s1726_s18 + $0x30] sm:$0xff] %v767_v59  ;;  %v738_v0 = vmul.f32 %v697_v61, %v626_v56  ;;  %v737_v1 = vmul.f32 %v692_v63, %v625_v57 }
 0x198   : > { %782 = vst [vmem:[%s1726_s18 + $0x28] sm:$0xff] %v766_v48 }
 0x199   : > { %v770_v4 = vadd.f32 %v754_v60, %v738_v0  ;;  %v769_v5 = vadd.f32 %v753_v62, %v737_v1 }
 0x19a   : > { %v707_v7 = vpop.permute.xlu1 %706  ;;  %v702_v9 = vpop.permute.xlu0 %701 }
 0x19b   : > { %786 = vst [vmem:[%s1726_s18 + $0x48] sm:$0xff] %v770_v4  ;;  %785 = vst [vmem:[%s1726_s18 + $0x40] sm:$0xff] %v769_v5  ;;  %v740_v10 = vmul.f32 %v707_v7, %v628_v2  ;;  %v739_v11 = vmul.f32 %v702_v9, %v627_v3 }
 0x19d   : > { %v772_v14 = vadd.f32 %v756_v6, %v740_v10  ;;  %v771_v15 = vadd.f32 %v755_v8, %v739_v11 }
 0x19e   : > { %v717_v17 = vpop.permute.xlu1 %716  ;;  %v712_v19 = vpop.permute.xlu0 %711 }
 0x19f   : > { %788 = vst [vmem:[%s1726_s18 + $0x58] sm:$0xff] %v772_v14  ;;  %787 = vst [vmem:[%s1726_s18 + $0x50] sm:$0xff] %v771_v15  ;;  %v742_v20 = vmul.f32 %v717_v17, %v630_v12  ;;  %v741_v21 = vmul.f32 %v712_v19, %v629_v13 }
 0x1a1   : > { %v774_v24 = vadd.f32 %v758_v16, %v742_v20  ;;  %v773_v25 = vadd.f32 %v757_v18, %v741_v21 }
 0x1a2   : > { %v727_v27 = vpop.permute.xlu1 %726 }
 0x1a3   : > { %790 = vst [vmem:[%s1726_s18 + $0x68] sm:$0xff] %v774_v24  ;;  %789 = vst [vmem:[%s1726_s18 + $0x60] sm:$0xff] %v773_v25  ;;  %v744_v30 = vmul.f32 %v727_v27, %v632_v22 }
 0x1a5   : > { %v776_v32 = vadd.f32 %v760_v26, %v744_v30 }
 0x1a7   : > { %792 = vst [vmem:[%s1726_s18 + $0x78] sm:$0xff] %v776_v32 }
 0x1ff   : > { %v722_v29 = vpop.permute.xlu0 %721 }
 0x200   : > { %v743_v31 = vmul.f32 %v722_v29, %v631_v23 }
 0x202   : > { %v775_v33 = vadd.f32 %v759_v28, %v743_v31 }
 0x204   : > { %791 = vst [vmem:[%s1726_s18 + $0x70] sm:$0xff] %v775_v33 }
 0x205 PF: > { %s983_s2 = sshll.u32 %s1403_s25, 11  ;;  %s1992_s10 = sld [smem:[#allocation19_spill]] }
 0x206   : > { %s807_s0 = sshll.u32 %s1726_s18, 4  ;;  %s1869_s27 = scalar_lea.sflag [#allocation4], %s301_s30  ;;  %s1865_s0 = int_to_ptr.vmem [resolvable:$true] %s807_s0 }
 0x207   : > { %s1265_s24 = scalar_lea.vmem %s1865_s0, 2048  ;;  %p1993_p9 = scmp.ne.s32.totalorder %s1980_s6, 0 }
 0x208   : > { %p1266_p10 = scmp.ne.s32.totalorder %s1865_s0, %s1265_s24  ;;  %s1424_s25 = smov [#allocation7]  }
 0x209   : > { %s1269_s5 = sshll.u32 %s1424_s25, 4  ;;  %s1270_s5 = int_to_ptr.vmem [resolvable:$false] %s1269_s5 }
 0x20a   : > { %p1267_p3 = pnand %p1266_p10, %p1993_p9  ;;  %s1271_s11 = scalar_lea.vmem %s1270_s5, 4096 }
 0x20b   : > { %s1862_s26 = scalar_lea.hbm %s1992_s10, %s983_s2  ;;  %p1272_p11 = scmp.lt.s32.totalorder %s1865_s0, %s1270_s5 }
 0x20c   : > { %p1268_p6 = pneg %p1267_p3  ;;  %p1273_p12 = scmp.lt.s32.totalorder %s1271_s11, %s1265_s24 }
 0x20e   : > { %p1274_p0 = por %p1273_p12, %p1272_p11 }
 0x210   : > { %p1275_p8 = pnand %p1274_p0, %p1268_p6 }
 0x212   : > { %1278 = shalt.err (!%p1275_p8)
}
 0x213   : > { %s1279_s30 = scalar_lea.hbm %s1862_s26, 2048  ;;  %s1283_s18 = scalar_lea.hbm %s1992_s10, 6144 }
 0x214   : > { %p1280_p7 = scmp.ne.s32.totalorder %s1862_s26, %s1279_s30  ;;  %p1284_p4 = scmp.lt.u32.totalorder %s1862_s26, %s1992_s10 }
 0x215   : > { %p1285_p2 = scmp.lt.u32.totalorder %s1283_s18, %s1279_s30  ;;  %p1287_p10 = scmp.lt.u32.totalorder %s1279_s30, %s1862_s26 }
 0x216   : > { %p1281_p1 = pnand %p1280_p7, %p1993_p9 }
 0x217   : > { %p1286_p13 = por %p1285_p2, %p1284_p4 }
 0x218   : > { %p1282_p5 = pneg %p1281_p1 }
 0x219   : > { %p1288_p3 = por %p1287_p10, %p1286_p13 }
 0x21b   : > { %p1289_p6 = pnand %p1288_p3, %p1282_p5 }
 0x21d   : > { %1292 = shalt.err (!%p1289_p6)
}
 0x21e   : > { %s1425_s2 = smov 128   ;;  %s1426_s14 = smov 8  }
 0x21f   : > { %1053 = dma.vmem_to_hbm [thread:$0]  (%p1993_p9), %s1865_s0, 2048, %s1862_s26, %s1869_s27, %s1425_s2, %s1425_s2, %s1426_s14  }
 0x220 PF: > { %p1067_p11 = scmp.ge.s32.totalorder %s1415_s28, 2  ;;  %s822_s4 = sand.u32 1, %s1363_s15  }
 0x221   : > { %p1994_p12 = scmp.ne.s32.totalorder %s1981_s7, 0  ;;  %s823_s24 = scalar_lea.sflag [#allocation4], %s822_s4 }
 0x223   : > { %p1063_p0 = pnand %p1067_p11, %p1994_p12 }
 0x225   : > { %1358 = dma.done.wait (!%p1063_p0), %s823_s24, 2048  }
 0x226   : > { %1360 = vsyncadd (!%p1063_p0), %s823_s24, 4294965248  ;;  %s23_s28 = sadd.s32 1, %s1415_s28   ;;  %s1996_s24 = sld [smem:[#allocation12_spill]] }
 0x227   : > { %p1898_p8 = scmp.ge.s32.totalorder %s23_s28, 11   ;;  %s1997_s6 = sld [smem:[#allocation13_spill]] }
 0x228   : > { %s1998_s26 = sld [smem:[#allocation14_spill]]  ;;  %s1999_s27 = sld [smem:[#allocation15_spill]] }
 0x229   : > { %s2001_s15 = smov %s1367_s16  ;;  %s2002_s16 = smov %s1371_s17 }
 0x22a   : > { %s2003_s17 = smov %s1553_s12  ;;  %s2004_s18 = smov %s1379_s19 }
 0x22b   : > { %s2005_s19 = smov %s1383_s20  ;;  %s2006_s20 = smov %s1619_s9 }
 0x22c   : > { %s2007_s21 = smov %s1391_s22  ;;  %s2008_s22 = smov %s1395_s23 }
 0x22d   : > { %s2009_s23 = smov %s1556_s13  ;;  %s2010_s25 = smov %s1997_s6 }
 0x22e   :  { %22 = sbr.rel (!%p1898_p8) target bundleno = 17 (0x11), region = 108 }
 0x235   :  { %828 = vsyncpa [#allocation3], 1 }
 0x236   :  { %830 = vsyncpa [#allocation3 + $0x1], 1 }
 0x237   :  { %831 = vsyncpa [#allocation6], 1 }
 0x238   :  { %833 = vsyncpa [#allocation6 + $0x1], 1 }
 0x239   :  { %834 = vsyncpa [#allocation4], 1 }
 0x23a   :  { %836 = vsyncpa [#allocation4 + $0x1], 1 }

</bundles_post_ra>
